<compile_context>
chip_gen: v5e
topology: v5e:2x2
jax: 0.10.0
libtpu: 0.0.40
codegen_flags: <defaults>
</compile_context>

<pallas_src>
import jax
import jax.numpy as jnp
from jax import lax
from jax.experimental import pallas as pl
from jax.experimental.pallas import tpu as pltpu


def _round_up(x, m):
    return ((x + m - 1) // m) * m


def _pos_emb_kernel(pos_ref, table_ref, out_ref):
    # pos_ref:   (n_tok_pad,) int32 in SMEM (scalar prefetch)
    # table_ref: (V_pad, D_pad) -- full embedding table, VMEM-resident
    # out_ref:   (T, D_pad)     -- lane-dense output tile for this grid step
    tile = pl.program_id(0)
    t_per_tile = out_ref.shape[0]
    base = tile * t_per_tile

    def body(r, carry):
        idx = pos_ref[base + r]                                   # SMEM scalar read
        out_ref[pl.ds(r, 1), :] = table_ref[pl.ds(idx, 1), :]     # VMEM->VMEM row copy
        return carry

    lax.fori_loop(0, t_per_tile, body, 0)


def positional_embedding(positions, table, *, tile_tokens=256):
    """positions: (B, S) int indices; table: (V, D) float -> (B, S, D)."""
    B, S = positions.shape
    V, D = table.shape
    n_tok = B * S

    # Lane/sublane-dense padded layout.
    d_pad = _round_up(D, 128)
    v_pad = _round_up(V, 8)

    # Token tile: multiple of 8 sublanes; amortizes per-grid-step overhead.
    t_tile = min(_round_up(tile_tokens, 8), _round_up(n_tok, 8))
    n_tok_pad = _round_up(n_tok, t_tile)
    grid = (n_tok_pad // t_tile,)

    # Clamp like jnp.take's TPU clip mode (nn.Embedding assumes valid indices);
    # also guarantees the dynamic row slice is always in range.
    flat_pos = jnp.clip(positions.reshape(-1), 0, V - 1).astype(jnp.int32)
    if n_tok_pad != n_tok:
        flat_pos = jnp.pad(flat_pos, (0, n_tok_pad - n_tok))

    table_pad = table
    if v_pad != V or d_pad != D:
        table_pad = jnp.pad(table, ((0, v_pad - V), (0, d_pad - D)))

    # VMEM budget: 2x table (double-buffer) + 2x output tile + slack; raise the
    # 16/32 MiB scoped default but stay well under v7x's 64 MiB physical VMEM.
    itemsize = jnp.dtype(table.dtype).itemsize
    vmem_need = (2 * v_pad * d_pad + 4 * t_tile * d_pad) * itemsize + (1 << 20)
    vmem_limit = int(min(max(vmem_need, 16 << 20), 48 << 20))
    # TODO(synk): for tables too large to sit in VMEM (>~48 MiB padded), fall
    # back to a tiled manual-DMA HBM gather (memory_space=pl.ANY + sem ring).

    out_pad = pl.pallas_call(
        _pos_emb_kernel,
        out_shape=jax.ShapeDtypeStruct((n_tok_pad, d_pad), table.dtype),
        grid_spec=pltpu.PrefetchScalarGridSpec(
            num_scalar_prefetch=1,                 # flat_pos -> SMEM
            grid=grid,
            in_specs=[
                # Whole table, constant block index -> fetched once, resident.
                pl.BlockSpec((v_pad, d_pad), lambda i, pos: (0, 0)),
            ],
            out_specs=pl.BlockSpec((t_tile, d_pad), lambda i, pos: (i, 0)),
        ),
        compiler_params=pltpu.CompilerParams(
            dimension_semantics=("parallel",),     # v7x: shard tiles over 2 TCs
            vmem_limit_bytes=vmem_limit,
        ),
    )(flat_pos, table_pad)

    return out_pad[:n_tok, :D].reshape(B, S, D)


if __name__ == "__main__":
    # Module hyperparameters (from __init__): max_seq_len, pos_emb_dim
    max_seq_len = 16
    pos_emb_dim = 32
    batch = 2
    seq_len = 8

    key = jax.random.PRNGKey(0)
    k_tbl, k_pos = jax.random.split(key)

    # nn.Embedding default init: weight ~ N(0, 1), shape (max_seq_len, pos_emb_dim)
    table = jax.random.normal(k_tbl, (max_seq_len, pos_emb_dim), dtype=jnp.float32)
    positions = jax.random.randint(
        k_pos, (batch, seq_len), 0, max_seq_len, dtype=jnp.int32
    )

    out = positional_embedding(positions, table)
    out = jax.block_until_ready(out)

    # Reference: plain gather (same semantics as nn.Embedding forward)
    ref = jnp.take(table, positions, axis=0)
    assert out.shape == (batch, seq_len, pos_emb_dim)
    assert out.dtype == jnp.float32
    assert jnp.allclose(out, ref), "mismatch vs reference gather"

    print("KERNEL_OK")
</pallas_src>

<mosaic_0001>
module attributes {stable_mosaic.version = 11 : i64} {
  func.func @_pos_emb_kernel(%arg0: i32, %arg1: memref<16xi32, #tpu.memory_space<smem>>, %arg2: memref<16x128xf32, #tpu.memory_space<vmem>>, %arg3: memref<16x128xf32, #tpu.memory_space<vmem>>) attributes {dimension_semantics = [#tpu.dimension_semantics<parallel>], iteration_bounds = array<i64: 1>, scalar_prefetch = 1 : i64, scratch_operands = 0 : i64, tpu.core_type = #tpu.core_type<tc>, window_params = [{pipeline_mode = #tpu.pipeline_mode<synchronous>, transform_indices = @transform_0, window_bounds = array<i64: 16, 128>}, {transform_indices = @transform_1, window_bounds = array<i64: 16, 128>}]} {
    %c16_i32 = arith.constant 16 : i32
    %0 = arith.muli %arg0, %c16_i32 : i32
    %c0_i32 = arith.constant 0 : i32
    %c16_i32_0 = arith.constant 16 : i32
    %1 = arith.addi %c0_i32, %c16_i32_0 : i32
    %c1_i32 = arith.constant 1 : i32
    scf.for %arg4 = %c0_i32 to %1 step %c1_i32  : i32 {
      %2 = arith.addi %0, %arg4 : i32
      %3 = arith.index_cast %2 : i32 to index
      %4 = memref.load %arg1[%3] : memref<16xi32, #tpu.memory_space<smem>>
      %5 = arith.index_cast %4 : i32 to index
      %c0 = arith.constant 0 : index
      %6 = vector.load %arg2[%5, %c0] : memref<16x128xf32, #tpu.memory_space<vmem>>, vector<1x128xf32>
      %7 = arith.index_cast %arg4 : i32 to index
      %c0_2 = arith.constant 0 : index
      %8 = vector.load %arg3[%7, %c0_2] : memref<16x128xf32, #tpu.memory_space<vmem>>, vector<1x128xf32>
      tpu.vector_store %arg3[%7, %c0_2], %6 {strides = array<i32>} : memref<16x128xf32, #tpu.memory_space<vmem>>, vector<1x128xf32>,
    }
    %c16_i32_1 = arith.constant 16 : i32
    return
  }
  func.func @transform_0(%arg0: i32, %arg1: memref<16xi32, #tpu.memory_space<smem>>) -> (i32, i32) {
    %c0_i32 = arith.constant 0 : i32
    %c0_i32_0 = arith.constant 0 : i32
    %c0_i32_1 = arith.constant 0 : i32
    return %c0_i32, %c0_i32_0 : i32, i32
  }
  func.func @transform_1(%arg0: i32, %arg1: memref<16xi32, #tpu.memory_space<smem>>) -> (i32, i32) {
    %c0_i32 = arith.constant 0 : i32
    %c0_i32_0 = arith.constant 0 : i32
    return %arg0, %c0_i32 : i32, i32
  }
}

</mosaic_0001>

<bundles_post_ra>
// kernel: tpu_custom_call.1
= control target key start
LH: loop header
LB: loop body
LE: loop exit
PB: predicated region body
PF: predicated region fallthrough
CT: control target
= control target key end

     0   :  { %s160_s12 = smov [#allocation3]   ;;  %s189_s0 = inlined_call_operand.hbm [shape: s32[16], index: 0, kind: input, shape index: {}]   ;;  %s190_s1 = inlined_call_operand.hbm [shape: f32[16,128], index: 1, kind: input, shape index: {}]   ;;  %s191_s2 = inlined_call_operand.hbm [shape: f32[16,128], index: 2, kind: output, shape index: {}]  }
   0x1   :  { %s8_s11 = sshll.u32 %s189_s0, 4  ;;  %s9_s11 = int_to_ptr.hbm [resolvable:$true] %s8_s11 }
   0x2   :  { %11 = dma.hbm_to_smem %s9_s11, 16, %s160_s12, [#allocation2] }
   0x3   :  { %150 = dma.done.wait [#allocation2], 16 }
   0x4   :  { %151 = vsyncadd [#allocation2], 4294967280 }
   0x5   :  { %14 = sfence }
   0x6   :  { %15 = vsyncpa [#allocation5], 0 }
   0x7   :  { %16 = vsyncpa [#allocation6], 0  ;;  %s21_s15 = sshll.u32 %s190_s1, 4  ;;  %s161_s16 = smov [#allocation4]   ;;  %s22_s15 = int_to_ptr.hbm [resolvable:$true] %s21_s15 }
   0x8   :  { %s23_s17 = sshll.u32 %s161_s16, 4  ;;  %s162_s18 = smov 128   ;;  %s24_s17 = int_to_ptr.vmem [resolvable:$true] %s23_s17 }
   0x9   :  { %s163_s19 = smov 8  }
   0xa   :  { %29 = dma.hbm_to_vmem [thread:$0]  %s22_s15, 256, %s24_s17, [#allocation5], %s162_s18, %s162_s18, %s163_s19  }
   0xb   :  { %152 = dma.done.wait [#allocation5], 256  }
   0xc   :  { %153 = vsyncadd [#allocation5], 4294967040  ;;  %s156_s0 = smov 0  }
   0xd LB: > { %s42_s20 = sld [smem:[#allocation3 + %s158_s0]]  ;;  %s45_s22 = scalar_lea.vmem [#allocation7], %s158_s0  ;;  %s158_s0 = sphi %s156_s0, %s40_s0  }
   0xe   : > { %s40_s0 = sadd.s32 1, %s158_s0  }
   0xf   : > { %p37_p0 = scmp.ge.s32.totalorder %s40_s0, 16  }
  0x10   :  { %s53_s24 = sshll.u32 (%p37_p0), %s191_s2, 4  ;;  %s164_s25 = smov (%p37_p0), [#allocation7]   ;;  %s54_s24 = int_to_ptr.hbm [resolvable:$true] %s53_s24 }
  0x11   :  { %39 = sbr.rel (!%p37_p0) target bundleno = 13 (0xd), region = 37  ;;  %s51_s26 = sshll.u32 (%p37_p0), %s164_s25, 4  ;;  %s52_s26 = int_to_ptr.vmem [resolvable:$true] %s51_s26 }
  0x13   : > { %s43_s21 = scalar_lea.vmem [#allocation4], %s42_s20 }
  0x14   : > { %v44_v0 = vld [vmem:[%s43_s21] sm:$0x1] }
  0x15   : > { %46 = vst [vmem:[%s45_s22] sm:$0x1] %v44_v0 }
  0x16   :  { %59 = dma.vmem_to_hbm [thread:$0]  %s52_s26, 256, %s54_s24, [#allocation6], %s162_s18, %s162_s18, %s163_s19  }
  0x17   :  { %154 = dma.done.wait [#allocation6], 256  }
  0x18   :  { %155 = vsyncadd [#allocation6], 4294967040 }
  0x19   :  { %64 = vsyncpa [#allocation5], 1 }
  0x1a   :  { %65 = vsyncpa [#allocation6], 1 }

</bundles_post_ra>
